<compile_context>
chip_gen: v7x
topology: tpu7x:2x2x1
jax: 0.10.0
libtpu: 0.0.40
codegen_flags: <defaults>
</compile_context>

<pallas_src>
import jax
import jax.numpy as jnp
from jax.experimental import pallas as pl
from jax.experimental.pallas import tpu as pltpu

_LANE = 128


def _round_up(x, m):
    return ((x + m - 1) // m) * m


def _critic_kernel(x_ref, w1_ref, b1_ref, w2_ref, b2_ref, out_ref):
    # x_ref  : (TB, S)   streamed batch tile (f32 or bf16, straight from the producer)
    # w1_ref : (H, S)    fc1 weight, native nn.Linear (out, in) layout, resident in VMEM
    # b1_ref : (H, 1)    fc1 bias (column vector), resident
    # w2_ref : (O, H)    value-head weight, resident
    # b2_ref : (O, 1)    value-head bias (column vector), resident
    # out_ref: (O, TB)   transposed, lane-dense-in-batch output tile
    x = x_ref[...]
    if x.dtype != jnp.float32:
        x = x.astype(jnp.float32)          # in-VMEM upcast; no extra HBM pass

    # fc1 in the transposed orientation: (H, S) . (TB, S)^T -> (H, TB).
    # Batch lands on the 128-lane axis, so everything downstream is lane-dense.
    hT = jax.lax.dot_general(
        w1_ref[...], x,
        dimension_numbers=(((1,), (1,)), ((), ())),
        preferred_element_type=jnp.float32,
    )
    hT = jnp.maximum(hT + b1_ref[...], 0.0)          # bias + ReLU on the VPU, f32

    # value head: (O, H) . (H, TB) -> (O, TB), canonical MXU orientation.
    vT = jax.lax.dot_general(
        w2_ref[...], hT,
        dimension_numbers=(((1,), (0,)), ((), ())),
        preferred_element_type=jnp.float32,
    )
    out_ref[...] = (vT + b2_ref[...]).astype(out_ref.dtype)


def _critic_forward(x, w1, b1, w2, b2, *, block_batch=8192, vmem_limit_mb=32):
    """x: (B, state_space); w1: (hidden, state); b1: (hidden,);
    w2: (out, hidden); b2: (out,) — nn.Linear's native (out, in) weight layout.
    Returns (B, out) float32, matching Critic.forward."""
    B, S = x.shape
    H, S2 = w1.shape
    O, H2 = w2.shape
    assert S == S2 and H == H2 and b1.shape == (H,) and b2.shape == (O,)

    # ---- batch tile selection --------------------------------------------
    # TB must be a multiple of 128 so the (O, TB) output stores stay full-lane.
    block_batch = max(_LANE, _round_up(block_batch, _LANE))
    tb_full = _round_up(B, _LANE)
    TB = min(block_batch, tb_full)
    if tb_full <= block_batch and B >= 2 * _LANE:
        # Whole batch would fit in one tile: split into (at least) two so the
        # "parallel" batch axis actually gives both v7x TensorCores work.
        TB = _round_up(pl.cdiv(B, 2), _LANE)
    n_steps = pl.cdiv(B, TB)
    B_grid = n_steps * TB

    # No full-array pad of x on the dominant stream: the trailing partial tile
    # reads past B (undefined rows), but those rows only feed output columns
    # >= B, which are sliced off below.  Only sub-tile batches (B < TB, i.e.
    # small inputs) get a tiny one-off pad so the single block never exceeds
    # the array extent.
    x_in = x
    if B < TB:
        x_in = jnp.pad(x, ((0, TB - B), (0, 0)))

    w1_f = w1.astype(jnp.float32)                    # tiny, one-off
    w2_f = w2.astype(jnp.float32)
    b1_col = b1.reshape(H, 1).astype(jnp.float32)
    b2_col = b2.reshape(O, 1).astype(jnp.float32)

    vT = pl.pallas_call(
        _critic_kernel,
        out_shape=jax.ShapeDtypeStruct((O, B_grid), jnp.float32),
        grid=(n_steps,),
        in_specs=[
            pl.BlockSpec((TB, S), lambda i: (i, 0)),   # x tile: streamed / double-buffered
            pl.BlockSpec((H, S), lambda i: (0, 0)),    # fc1 weight: resident across steps
            pl.BlockSpec((H, 1), lambda i: (0, 0)),    # fc1 bias: resident
            pl.BlockSpec((O, H), lambda i: (0, 0)),    # value-head weight: resident
            pl.BlockSpec((O, 1), lambda i: (0, 0)),    # value-head bias: resident
        ],
        out_specs=pl.BlockSpec((O, TB), lambda i: (0, i)),   # lane-dense in batch
        compiler_params=pltpu.CompilerParams(
            dimension_semantics=("parallel",),         # shard batch across v7x's 2 TCs
            vmem_limit_bytes=vmem_limit_mb * 1024 * 1024,
        ),
    )(x_in, w1_f, b1_col, w2_f, b2_col)

    # Tiny epilogue: drop padded batch columns, return (B, O) like the module.
    return vT[:, :B].T


critic_forward = jax.jit(_critic_forward, static_argnames=("block_batch", "vmem_limit_mb"))


def init_linear_params(key, in_features, out_features, dtype=jnp.float32):
    # nn.Linear default init: U(-1/sqrt(fan_in), 1/sqrt(fan_in)) for weight and bias.
    kw, kb = jax.random.split(key)
    bound = 1.0 / (in_features ** 0.5)
    w = jax.random.uniform(kw, (out_features, in_features), dtype, -bound, bound)
    b = jax.random.uniform(kb, (out_features,), dtype, -bound, bound)
    return w, b


def _reference(x, w1, b1, w2, b2):
    return jnp.maximum(x @ w1.T + b1, 0.0) @ w2.T + b2


if __name__ == "__main__":
    # Shapes consistent with the module: state_space=16, hidden=32, output=1, batch=2.
    batch, state_space, hidden_size, output_size = 2, 16, 32, 1

    key = jax.random.PRNGKey(0)
    kx, k1, k2, kx2 = jax.random.split(key, 4)

    x = jax.random.normal(kx, (batch, state_space), jnp.float32)
    w1, b1 = init_linear_params(k1, state_space, hidden_size)
    w2, b2 = init_linear_params(k2, hidden_size, output_size)

    # f32 path (exact semantics of the PyTorch module), single small tile.
    value = critic_forward(x, w1, b1, w2, b2)
    jax.block_until_ready(value)
    assert value.shape == (batch, output_size)
    assert jnp.allclose(value, _reference(x, w1, b1, w2, b2), atol=1e-4, rtol=1e-4)

    # Ragged multi-tile path: B=1000 -> two 512-row tiles, trailing tile partial
    # (no wrapper-side pad of x; padded output columns are sliced off).
    x_big = jax.random.normal(kx2, (1000, state_space), jnp.float32)
    value_big = critic_forward(x_big, w1, b1, w2, b2)
    jax.block_until_ready(value_big)
    assert value_big.shape == (1000, output_size)
    assert jnp.allclose(value_big, _reference(x_big, w1, b1, w2, b2),
                        atol=1e-4, rtol=1e-4)

    # Producer-side bf16 activations: no wrapper cast; the kernel upcasts in VMEM.
    value_bf16 = critic_forward(x_big.astype(jnp.bfloat16), w1, b1, w2, b2)
    jax.block_until_ready(value_bf16)
    assert value_bf16.shape == (1000, output_size)
    assert jnp.allclose(value_bf16, _reference(x_big, w1, b1, w2, b2),
                        atol=5e-2, rtol=5e-2)

    print("KERNEL_OK")
</pallas_src>

<mosaic_0001>
module attributes {stable_mosaic.version = 11 : i64} {
  func.func @_critic_kernel(%arg0: i32, %arg1: memref<128x16xf32, #tpu.memory_space<vmem>>, %arg2: memref<32x16xf32, #tpu.memory_space<vmem>>, %arg3: memref<32x1xf32, #tpu.memory_space<vmem>>, %arg4: memref<1x32xf32, #tpu.memory_space<vmem>>, %arg5: memref<1x1xf32, #tpu.memory_space<vmem>>, %arg6: memref<1x128xf32, #tpu.memory_space<vmem>>) attributes {dimension_semantics = [#tpu.dimension_semantics<parallel>], iteration_bounds = array<i64: 1>, scalar_prefetch = 0 : i64, scratch_operands = 0 : i64, tpu.core_type = #tpu.core_type<tc>, window_params = [{transform_indices = @transform_0, window_bounds = array<i64: 128, 16>}, {pipeline_mode = #tpu.pipeline_mode<synchronous>, transform_indices = @transform_1, window_bounds = array<i64: 32, 16>}, {pipeline_mode = #tpu.pipeline_mode<synchronous>, transform_indices = @transform_2, window_bounds = array<i64: 32, 1>}, {pipeline_mode = #tpu.pipeline_mode<synchronous>, transform_indices = @transform_3, window_bounds = array<i64: 1, 32>}, {pipeline_mode = #tpu.pipeline_mode<synchronous>, transform_indices = @transform_4, window_bounds = array<i64: 1, 1>}, {transform_indices = @transform_5, window_bounds = array<i64: 1, 128>}]} {
    %c0 = arith.constant 0 : index
    %c0_0 = arith.constant 0 : index
    %0 = vector.load %arg1[%c0, %c0_0] : memref<128x16xf32, #tpu.memory_space<vmem>>, vector<128x16xf32>
    %c0_1 = arith.constant 0 : index
    %c0_2 = arith.constant 0 : index
    %1 = vector.load %arg2[%c0_1, %c0_2] : memref<32x16xf32, #tpu.memory_space<vmem>>, vector<32x16xf32>
    %cst = arith.constant dense<0.000000e+00> : vector<32x128xf32>
    %2 = tpu.matmul %1, %0, %cst {dimension_numbers = #tpu.dot_dimension_numbers<[1], [1], [0], [0], [0, 0, 1, 0], [], []>} : vector<32x16xf32>, vector<128x16xf32>, vector<32x128xf32> -> vector<32x128xf32>
    %c0_3 = arith.constant 0 : index
    %c0_4 = arith.constant 0 : index
    %3 = vector.load %arg3[%c0_3, %c0_4] : memref<32x1xf32, #tpu.memory_space<vmem>>, vector<32x1xf32>
    %4 = vector.broadcast %3 : vector<32x1xf32> to vector<32x128xf32>
    %5 = arith.addf %2, %4 : vector<32x128xf32>
    %cst_5 = arith.constant 0.000000e+00 : f32
    %6 = vector.broadcast %cst_5 : f32 to vector<32x128xf32>
    %7 = arith.maximumf %5, %6 : vector<32x128xf32>
    %c0_6 = arith.constant 0 : index
    %c0_7 = arith.constant 0 : index
    %8 = vector.load %arg4[%c0_6, %c0_7] : memref<1x32xf32, #tpu.memory_space<vmem>>, vector<1x32xf32>
    %cst_8 = arith.constant dense<0.000000e+00> : vector<1x128xf32>
    %9 = tpu.matmul %8, %7, %cst_8 {dimension_numbers = #tpu.dot_dimension_numbers<[1], [0], [0], [1], [0, 0, 1, 1], [], []>} : vector<1x32xf32>, vector<32x128xf32>, vector<1x128xf32> -> vector<1x128xf32>
    %c0_9 = arith.constant 0 : index
    %c0_10 = arith.constant 0 : index
    %10 = vector.load %arg5[%c0_9, %c0_10] : memref<1x1xf32, #tpu.memory_space<vmem>>, vector<1x1xf32>
    %11 = vector.broadcast %10 : vector<1x1xf32> to vector<1x128xf32>
    %12 = arith.addf %9, %11 : vector<1x128xf32>
    %c0_11 = arith.constant 0 : index
    %c0_12 = arith.constant 0 : index
    %13 = vector.load %arg6[%c0_11, %c0_12] : memref<1x128xf32, #tpu.memory_space<vmem>>, vector<1x128xf32>
    tpu.vector_store %arg6[%c0_11, %c0_12], %12 {strides = array<i32>} : memref<1x128xf32, #tpu.memory_space<vmem>>, vector<1x128xf32>,
    return
  }
  func.func @transform_0(%arg0: i32) -> (i32, i32) {
    %c0_i32 = arith.constant 0 : i32
    %c0_i32_0 = arith.constant 0 : i32
    return %arg0, %c0_i32 : i32, i32
  }
  func.func @transform_1(%arg0: i32) -> (i32, i32) {
    %c0_i32 = arith.constant 0 : i32
    %c0_i32_0 = arith.constant 0 : i32
    %c0_i32_1 = arith.constant 0 : i32
    return %c0_i32, %c0_i32_0 : i32, i32
  }
  func.func @transform_2(%arg0: i32) -> (i32, i32) {
    %c0_i32 = arith.constant 0 : i32
    %c0_i32_0 = arith.constant 0 : i32
    %c0_i32_1 = arith.constant 0 : i32
    return %c0_i32, %c0_i32_0 : i32, i32
  }
  func.func @transform_3(%arg0: i32) -> (i32, i32) {
    %c0_i32 = arith.constant 0 : i32
    %c0_i32_0 = arith.constant 0 : i32
    %c0_i32_1 = arith.constant 0 : i32
    return %c0_i32, %c0_i32_0 : i32, i32
  }
  func.func @transform_4(%arg0: i32) -> (i32, i32) {
    %c0_i32 = arith.constant 0 : i32
    %c0_i32_0 = arith.constant 0 : i32
    %c0_i32_1 = arith.constant 0 : i32
    return %c0_i32, %c0_i32_0 : i32, i32
  }
  func.func @transform_5(%arg0: i32) -> (i32, i32) {
    %c0_i32 = arith.constant 0 : i32
    %c0_i32_0 = arith.constant 0 : i32
    return %c0_i32, %arg0 : i32, i32
  }
}

</mosaic_0001>

<bundles_post_ra>
// kernel: _critic_forward.1
= control target key start
LH: loop header
LB: loop body
LE: loop exit
PB: predicated region body
PF: predicated region fallthrough
CT: control target
= control target key end

     0   :  { %vm66_vm0 = vcmask 130048   ;;  %v461_v3 = vmov 0   ;;  %v462_v36 = vmov 0.0|0.0   ;;  %vm463_vm2 = vmmov 0   ;;  %s618_s0 = inlined_call_operand.vmem [shape: f32[128,16], index: 0, kind: input, shape index: {}]   ;;  %s619_s4 = inlined_call_operand.<no memory space> [shape: f32[1,1], index: 4, kind: input, shape index: {}]   ;;  %s620_s1 = inlined_call_operand.vmem [shape: f32[32,16], index: 1, kind: input, shape index: {}]   ;;  %s621_s2 = inlined_call_operand.vmem [shape: f32[32,1], index: 2, kind: input, shape index: {}]   ;;  %s622_s3 = inlined_call_operand.vmem [shape: f32[1,32], index: 3, kind: input, shape index: {}]   ;;  %s623_s5 = inlined_call_operand.vmem [shape: f32[1,128], index: 5, kind: output, shape index: {}]  }
   0x1   :  { %v22_v0 = vld [vmem:[%s618_s0] sm:$0xff]  ;;  %v23_v1 = vld [vmem:[%s618_s0 + $0x8] sm:$0xff]  ;;  %vm503_vm1 = vmpackc.low %vm66_vm0, %vm66_vm0  ;;  %459 = vset.pattern.permute.xlu0 %v461_v3  ;;  %460 = vset.pattern.permute.xlu1 %v461_v3  ;;  %v10_v4 = vstv %s619_s4  ;;  %v464_v37 = vmov 0.0   ;;  %vm227_vm3 = vcmask 261120   ;;  %v223_v57 = vlaneseq }
   0x2   :  { %v401_v5 = vpack.c.bf16 %v23_v1, %v22_v0  ;;  %v24_v6 = vld [vmem:[%s618_s0 + $0x10] sm:$0xff]  ;;  %v25_v7 = vld [vmem:[%s618_s0 + $0x18] sm:$0xff]  ;;  %11 = vst [vmem:[#allocation2] sm:$0x1] %v10_v4  ;;  %v38_v9 = vld [vmem:[%s620_s1] sm:$0xff]  ;;  %449 = vmatprep.subr.bf16.mxu1 %v462_v36  ;;  %398 = vmatprep.mubr.msk.f32.mxu1 %vm463_vm2, %v464_v37 }
   0x3   :  { %v407_v8 = vpack.c.bf16 %v25_v7, %v24_v6  ;;  %v26_v10 = vld [vmem:[%s618_s0 + $0x20] sm:$0xff]  ;;  %v27_v11 = vld [vmem:[%s618_s0 + $0x28] sm:$0xff]  ;;  %384 = vmatprep.mubr.msk.f32.mxu0 %vm66_vm0, %v38_v9  ;;  %v44_v13 = vld [vmem:[%s621_s2 + $0x10] sm:$0xff]  ;;  %v224_v58 = vshrl.u32 %v223_v57, 7 }
   0x4   :  { %403 = vmatprep.subr.msk.bf16.mxu0 %vm503_vm1, %v401_v5  ;;  %v42_v12 = vld [vmem:[%s621_s2] sm:$0xff]  ;;  %58 = vperm.xlu1 %460, %v44_v13   ;;  %v413_v14 = vpack.c.bf16 %v27_v11, %v26_v10  ;;  %v43_v15 = vld [vmem:[%s621_s2 + $0x8] sm:$0xff]  ;;  %v45_v16 = vld [vmem:[%s621_s2 + $0x18] sm:$0xff] }
   0x5   :  { %406 = vmatpush3.bf16.xpose.msk.msra.mxu0 %vm503_vm1, %v401_v5  ;;  %48 = vperm.xlu0 %459, %v42_v12   ;;  %v28_v18 = vld [vmem:[%s618_s0 + $0x30] sm:$0xff]  ;;  %v29_v19 = vld [vmem:[%s618_s0 + $0x38] sm:$0xff]  ;;  %v30_v21 = vld [vmem:[%s618_s0 + $0x40] sm:$0xff]  ;;  %v225_v59 = vsub.s32 0, %v224_v58 }
   0x6   :  { %409 = vmatprep.subr.msk.bf16.mxu0 %vm503_vm1, %v407_v8  ;;  %v419_v20 = vpack.c.bf16 %v29_v19, %v28_v18  ;;  %v31_v22 = vld [vmem:[%s618_s0 + $0x48] sm:$0xff]  ;;  %v32_v24 = vld [vmem:[%s618_s0 + $0x50] sm:$0xff]  ;;  %v33_v25 = vld [vmem:[%s618_s0 + $0x58] sm:$0xff] }
   0x7   :  { %v425_v23 = vpack.c.bf16 %v31_v22, %v30_v21  ;;  %v431_v26 = vpack.c.bf16 %v33_v25, %v32_v24  ;;  %v34_v27 = vld [vmem:[%s618_s0 + $0x60] sm:$0xff]  ;;  %v35_v28 = vld [vmem:[%s618_s0 + $0x68] sm:$0xff]  ;;  %v36_v30 = vld [vmem:[%s618_s0 + $0x70] sm:$0xff] }
   0x8   :  { %63 = vperm.xlu1 %460, %v45_v16   ;;  %v437_v29 = vpack.c.bf16 %v35_v28, %v34_v27  ;;  %v37_v31 = vld [vmem:[%s618_s0 + $0x78] sm:$0xff]  ;;  %v39_v33 = vld [vmem:[%s620_s1 + $0x8] sm:$0xff]  ;;  %v40_v34 = vld [vmem:[%s620_s1 + $0x10] sm:$0xff] }
   0x9   :  { %53 = vperm.xlu0 %459, %v43_v15   ;;  %v217_v17 = vld [vmem:[#allocation2] sm:$0x1]  ;;  %v443_v32 = vpack.c.bf16 %v37_v31, %v36_v30  ;;  %v41_v35 = vld [vmem:[%s620_s1 + $0x18] sm:$0xff] }
   0xa   :  { %v216_v56 = vld [vmem:[%s622_s3] sm:$0x1] }
   0xd   :  { %412 = vmatpush3.bf16.xpose.msk.msra.mxu0 %vm503_vm1, %v407_v8  ;;  %220 = vperm.xlu0 %459, %v217_v17  }
   0xe   :  { %415 = vmatprep.subr.msk.bf16.mxu0 %vm503_vm1, %v413_v14 }
  0x15   :  { %418 = vmatpush3.bf16.xpose.msk.msra.mxu0 %vm503_vm1, %v413_v14 }
  0x16   :  { %421 = vmatprep.subr.msk.bf16.mxu0 %vm503_vm1, %v419_v20 }
  0x1d   :  { %424 = vmatpush3.bf16.xpose.msk.msra.mxu0 %vm503_vm1, %v419_v20 }
  0x1e   :  { %427 = vmatprep.subr.msk.bf16.mxu0 %vm503_vm1, %v425_v23 }
  0x25   :  { %430 = vmatpush3.bf16.xpose.msk.msra.mxu0 %vm503_vm1, %v425_v23 }
  0x26   :  { %433 = vmatprep.subr.msk.bf16.mxu0 %vm503_vm1, %v431_v26 }
  0x2d   :  { %436 = vmatpush3.bf16.xpose.msk.msra.mxu0 %vm503_vm1, %v431_v26 }
  0x2e   :  { %439 = vmatprep.subr.msk.bf16.mxu0 %vm503_vm1, %v437_v29 }
  0x35   :  { %442 = vmatpush3.bf16.xpose.msk.msra.mxu0 %vm503_vm1, %v437_v29 }
  0x36   :  { %445 = vmatprep.subr.msk.bf16.mxu0 %vm503_vm1, %v443_v32 }
  0x3d   :  { %448 = vmatpush3.bf16.xpose.msk.msra.mxu0 %vm503_vm1, %v443_v32 }
  0x44   :  { %385 = vmatmul.mubr.msk.f32.vlgmr.msra.gmra.mrb[0].mxu0 %vm66_vm0, %v39_v33 }
  0x45   :  { %387 = vmatprep.mubr.msk.f32.mxu0 %vm66_vm0, %v40_v34 }
  0x48   :  { %388 = vmatmul.mubr.msk.f32.gmra.mrb[2].mxu0 %vm66_vm0, %v41_v35 }
  0x83   :  { %v59_v39 = vpop.permute.xlu1 %58 }
  0x84   :  { %v49_v38 = vpop.permute.xlu0 %48 }
  0x87   :  { %v64_v46 = vpop.permute.xlu1 %63 }
  0x88   :  { %v54_v40 = vpop.permute.xlu0 %53 }
  0x8c   :  { %v221_v60 = vpop.permute.xlu0 %220 }
  0x8d   :  { %v226_v61 = vrot.slane %v221_v60, %v225_v59 }
 0x117   :  { %v386_v41 = vpop.f32.mrb[0].mxu0 }
 0x118   :  { %v199_v42 = vadd.f32 %v386_v41, %v54_v40  ;;  %v193_v43 = vpop.f32.mrb[1].mxu0 }
 0x119   :  { %v194_v44 = vadd.f32 %v193_v43, %v49_v38 }
 0x11a   :  { %v213_v45 = vmax.f32 %v199_v42, 0.0 }
 0x11b   :  { %v212_v47 = vmax.f32 %v194_v44, 0.0  ;;  %v389_v48 = vpop.f32.mrb[2].mxu0 }
 0x11c   :  { %v209_v49 = vadd.f32 %v389_v48, %v64_v46  ;;  %v203_v50 = vpop.f32.mrb[3].mxu0 }
 0x11d   :  { %v204_v51 = vadd.f32 %v203_v50, %v59_v39  ;;  %v450_v52 = vpack.c.bf16 %v213_v45, %v212_v47 }
 0x11e   :  { %v215_v53 = vmax.f32 %v209_v49, 0.0 }
 0x11f   :  { %v214_v54 = vmax.f32 %v204_v51, 0.0  ;;  %451 = vmatpush3.bf16.msra.mxu1 %v450_v52 }
 0x120   :  { %452 = vmatprep.subr.bf16.mxu1 %v462_v36 }
 0x121   :  { %v453_v55 = vpack.c.bf16 %v215_v53, %v214_v54 }
 0x123   :  { %454 = vmatpush3.bf16.msra.mxu1 %v453_v55 }
 0x126   :  { %399 = vmatmul.mubr.msk.f32.vlgmr.msra.gmra.mrb[0].mxu1 %vm227_vm3, %v216_v56 }
 0x1f9   :  { %v297_v62 = vpop.f32.mrb[0].mxu1 }
 0x1fa   :  { %v298_v63 = vadd.f32 %v297_v62, %v226_v61  ;;  %v400_v0 = vpop.f32.mrb[1].mxu1 }
 0x1fc   :  { %301 = vst [vmem:[%s623_s5] sm:$0x1] %v298_v63 }

</bundles_post_ra>
